<compile_context>
chip_gen: v5e
topology: v5e:2x2
jax: 0.10.0
libtpu: 0.0.40
codegen_flags: <defaults>
</compile_context>

<pallas_src>
import functools

import jax
import jax.numpy as jnp
from jax.experimental import pallas as pl
from jax.experimental.pallas import tpu as pltpu

LANE = 128
SUBLANE = 8


def _round_up(n, m):
    return ((n + m - 1) // m) * m


def _net_kernel(x_ref, w1_ref, b1_ref, w2_ref, b2_ref, w3_ref, b3_ref,
                w4_ref, b4_ref, o_ref, *, seq_len, batches_per_block):
    # x_ref : (TB*S, Fp) bf16 ; w* : (in_p, out_p) bf16 ; b* : (1, out_p) f32
    # o_ref : (TB*S, Op) f32
    x = x_ref[...]

    # bf16 MXU operands, f32 accumulation; bias add / ReLU stay f32 (v5e-safe).
    h1 = jnp.maximum(
        jnp.dot(x, w1_ref[...], preferred_element_type=jnp.float32) + b1_ref[...], 0.0)
    h2 = jnp.maximum(
        jnp.dot(h1.astype(jnp.bfloat16), w2_ref[...],
                preferred_element_type=jnp.float32) + b2_ref[...], 0.0)
    # dropout (eval mode) == identity
    h3 = jnp.maximum(
        jnp.dot(h2.astype(jnp.bfloat16), w3_ref[...],
                preferred_element_type=jnp.float32) + b3_ref[...], 0.0)
    # dropout (eval mode) == identity
    logits = jnp.dot(h3.astype(jnp.bfloat16), w4_ref[...],
                     preferred_element_type=jnp.float32) + b4_ref[...]  # (TB*S, Op) f32

    # log_softmax over the sequence axis (PyTorch F.log_softmax(x, dim=1) for a
    # (B, S, O) input).  All softmax math stays f32 (required on v5e).
    op = o_ref.shape[-1]
    if seq_len % SUBLANE == 0:
        # Tile-aligned reshape: no relayout copy.
        lg = logits.reshape(batches_per_block, seq_len, op)
        m = jnp.max(lg, axis=1, keepdims=True)
        z = lg - m
        lse = jnp.log(jnp.sum(jnp.exp(z), axis=1, keepdims=True))
        o_ref[...] = (z - lse).reshape(batches_per_block * seq_len, op).astype(o_ref.dtype)
    else:
        # Unaligned S: per-batch static slices instead of a reshape that would
        # cross (8,128) tile boundaries.
        for b in range(batches_per_block):
            lo = b * seq_len
            lg = logits[lo:lo + seq_len, :]
            m = jnp.max(lg, axis=0, keepdims=True)
            z = lg - m
            lse = jnp.log(jnp.sum(jnp.exp(z), axis=0, keepdims=True))
            o_ref[lo:lo + seq_len, :] = (z - lse).astype(o_ref.dtype)


def make_net_forward(params, *, target_rows=512):
    """Pads / bf16-casts the parameters ONCE (hoisted out of the hot path) and
    returns a jitted `forward(x)` closure.  `params` stores weights as (in, out)
    and 1-D biases so that y = x @ W + b."""
    F, H1 = params["w1"].shape
    H2 = params["w2"].shape[1]
    H3 = params["w3"].shape[1]
    O = params["w4"].shape[1]

    Fp, H1p, H2p, H3p, Op = (_round_up(d, LANE) for d in (F, H1, H2, H3, O))

    def pad_w(w, rp, cp):
        r, c = w.shape
        return jnp.pad(w, ((0, rp - r), (0, cp - c))).astype(jnp.bfloat16)

    def pad_b(b, cp):
        return jnp.pad(b, (0, cp - b.shape[0])).reshape(1, cp).astype(jnp.float32)

    # One-time padded / pre-cast parameter copies (kept resident across calls).
    w1p, b1p = pad_w(params["w1"], Fp, H1p), pad_b(params["b1"], H1p)
    w2p, b2p = pad_w(params["w2"], H1p, H2p), pad_b(params["b2"], H2p)
    w3p, b3p = pad_w(params["w3"], H2p, H3p), pad_b(params["b3"], H3p)
    w4p, b4p = pad_w(params["w4"], H3p, Op), pad_b(params["b4"], Op)

    w_bytes = 2 * (Fp * H1p + H1p * H2p + H2p * H3p + H3p * Op)
    b_bytes = 4 * (H1p + H2p + H3p + Op)

    @jax.jit
    def forward(x):
        B, S, F_in = x.shape
        assert F_in == F, f"expected feature dim {F}, got {F_in}"

        # ---- M tile in whole batch elements, so the per-batch softmax reduction
        # never straddles a block boundary; tb*S must be a sublane multiple unless
        # a single full-extent block is used (always legal). ----
        tb = max(1, min(B, target_rows // max(S, 1)))
        while tb < B and (tb * S) % SUBLANE != 0:
            tb += 1
        if (tb * S) % SUBLANE != 0:
            tb = B
        num_blocks = pl.cdiv(B, tb)
        Bp = num_blocks * tb
        rows = tb * S

        # Fuse (B, S) into the matmul M dimension; lane-pad features; bf16 MXU
        # operands.  These pads/casts/reshapes fuse under jit.
        x2 = x.reshape(B * S, F)
        x2 = jnp.pad(x2, ((0, (Bp - B) * S), (0, Fp - F))).astype(jnp.bfloat16)

        kernel = functools.partial(_net_kernel, seq_len=S, batches_per_block=tb)

        flops = 2 * Bp * S * (Fp * H1p + H1p * H2p + H2p * H3p + H3p * Op)
        bytes_accessed = Bp * S * Fp * 2 + w_bytes + b_bytes + Bp * S * Op * 4
        cost = pl.CostEstimate(flops=flops,
                               transcendentals=Bp * S * Op,
                               bytes_accessed=bytes_accessed)

        # VMEM footprint estimate (double-buffered I/O + resident weights + acts).
        est = (w_bytes + b_bytes
               + 2 * rows * Fp * 2
               + 2 * rows * Op * 4
               + rows * (H1p + H2p + H3p + Op) * 6)
        vmem_limit = int(min(48 * 2 ** 20, 2 * est)) if 2 * est > 24 * 2 ** 20 else None

        out = pl.pallas_call(
            kernel,
            out_shape=jax.ShapeDtypeStruct((Bp * S, Op), jnp.float32),
            grid=(num_blocks,),
            in_specs=[
                pl.BlockSpec((rows, Fp), lambda i: (i, 0)),
                pl.BlockSpec((Fp, H1p), lambda i: (0, 0)),
                pl.BlockSpec((1, H1p), lambda i: (0, 0)),
                pl.BlockSpec((H1p, H2p), lambda i: (0, 0)),
                pl.BlockSpec((1, H2p), lambda i: (0, 0)),
                pl.BlockSpec((H2p, H3p), lambda i: (0, 0)),
                pl.BlockSpec((1, H3p), lambda i: (0, 0)),
                pl.BlockSpec((H3p, Op), lambda i: (0, 0)),
                pl.BlockSpec((1, Op), lambda i: (0, 0)),
            ],
            out_specs=pl.BlockSpec((rows, Op), lambda i: (i, 0)),
            compiler_params=pltpu.CompilerParams(
                dimension_semantics=("parallel",),
                vmem_limit_bytes=vmem_limit),
            cost_estimate=cost,
        )(x2, w1p, b1p, w2p, b2p, w3p, b3p, w4p, b4p)

        # Drop batch / feature padding; these slices fuse under jit.
        return out.reshape(Bp, S, Op)[:B, :, :O]

    return forward


def init_params(key, n_feature, n_hidden_1, n_hidden_2, n_hidden_3, n_output):
    """PyTorch-Linear-style uniform init; weights stored as (in, out)."""
    def linear(k, fan_in, fan_out):
        kw, kb = jax.random.split(k)
        bound = 1.0 / jnp.sqrt(fan_in)
        w = jax.random.uniform(kw, (fan_in, fan_out), jnp.float32, -bound, bound)
        b = jax.random.uniform(kb, (fan_out,), jnp.float32, -bound, bound)
        return w, b

    k1, k2, k3, k4 = jax.random.split(key, 4)
    w1, b1 = linear(k1, n_feature, n_hidden_1)
    w2, b2 = linear(k2, n_hidden_1, n_hidden_2)
    w3, b3 = linear(k3, n_hidden_2, n_hidden_3)
    w4, b4 = linear(k4, n_hidden_3, n_output)
    return dict(w1=w1, b1=b1, w2=w2, b2=b2, w3=w3, b3=b3, w4=w4, b4=b4)


def reference_forward(x, params):
    """Pure-JAX reference mirroring the kernel's bf16-matmul / f32-accumulate math."""
    bf = jnp.bfloat16
    dot = functools.partial(jnp.dot, preferred_element_type=jnp.float32)
    h = jnp.maximum(dot(x.astype(bf), params["w1"].astype(bf)) + params["b1"], 0.0)
    h = jnp.maximum(dot(h.astype(bf), params["w2"].astype(bf)) + params["b2"], 0.0)
    h = jnp.maximum(dot(h.astype(bf), params["w3"].astype(bf)) + params["b3"], 0.0)
    logits = dot(h.astype(bf), params["w4"].astype(bf)) + params["b4"]
    return jax.nn.log_softmax(logits, axis=1)


if __name__ == "__main__":
    # Small shapes consistent with the module's 3-D example input (1, 16, 2400):
    # batch=2, seq=16, n_feature=64, hiddens=32, n_output=8.
    B, S, F = 2, 16, 64
    H1 = H2 = H3 = 32
    O = 8

    key = jax.random.PRNGKey(0)
    kx, kp = jax.random.split(key)
    x = jax.random.normal(kx, (B, S, F), jnp.float32)
    params = init_params(kp, F, H1, H2, H3, O)

    net_forward = make_net_forward(params)           # one-time pad/cast, jitted closure
    out = jax.block_until_ready(net_forward(x))

    ref = reference_forward(x, params)
    assert out.shape == (B, S, O)
    assert jnp.allclose(out, ref, atol=1e-2, rtol=1e-2), "mismatch vs reference"

    print("KERNEL_OK")
</pallas_src>

<mosaic_0001>
module attributes {stable_mosaic.version = 11 : i64} {
  func.func @_net_kernel(%arg0: i32, %arg1: memref<32x128xbf16, #tpu.memory_space<vmem>>, %arg2: memref<128x128xbf16, #tpu.memory_space<vmem>>, %arg3: memref<1x128xf32, #tpu.memory_space<vmem>>, %arg4: memref<128x128xbf16, #tpu.memory_space<vmem>>, %arg5: memref<1x128xf32, #tpu.memory_space<vmem>>, %arg6: memref<128x128xbf16, #tpu.memory_space<vmem>>, %arg7: memref<1x128xf32, #tpu.memory_space<vmem>>, %arg8: memref<128x128xbf16, #tpu.memory_space<vmem>>, %arg9: memref<1x128xf32, #tpu.memory_space<vmem>>, %arg10: memref<32x128xf32, #tpu.memory_space<vmem>>) attributes {dimension_semantics = [#tpu.dimension_semantics<parallel>], iteration_bounds = array<i64: 1>, scalar_prefetch = 0 : i64, scratch_operands = 0 : i64, tpu.core_type = #tpu.core_type<tc>, window_params = [{transform_indices = @transform_0, window_bounds = array<i64: 32, 128>}, {pipeline_mode = #tpu.pipeline_mode<synchronous>, transform_indices = @transform_1, window_bounds = array<i64: 128, 128>}, {pipeline_mode = #tpu.pipeline_mode<synchronous>, transform_indices = @transform_2, window_bounds = array<i64: 1, 128>}, {pipeline_mode = #tpu.pipeline_mode<synchronous>, transform_indices = @transform_3, window_bounds = array<i64: 128, 128>}, {pipeline_mode = #tpu.pipeline_mode<synchronous>, transform_indices = @transform_4, window_bounds = array<i64: 1, 128>}, {pipeline_mode = #tpu.pipeline_mode<synchronous>, transform_indices = @transform_5, window_bounds = array<i64: 128, 128>}, {pipeline_mode = #tpu.pipeline_mode<synchronous>, transform_indices = @transform_6, window_bounds = array<i64: 1, 128>}, {pipeline_mode = #tpu.pipeline_mode<synchronous>, transform_indices = @transform_7, window_bounds = array<i64: 128, 128>}, {pipeline_mode = #tpu.pipeline_mode<synchronous>, transform_indices = @transform_8, window_bounds = array<i64: 1, 128>}, {transform_indices = @transform_9, window_bounds = array<i64: 32, 128>}]} {
    %c0 = arith.constant 0 : index
    %c0_0 = arith.constant 0 : index
    %0 = vector.load %arg1[%c0, %c0_0] : memref<32x128xbf16, #tpu.memory_space<vmem>>, vector<32x128xbf16>
    %c0_1 = arith.constant 0 : index
    %c0_2 = arith.constant 0 : index
    %1 = vector.load %arg2[%c0_1, %c0_2] : memref<128x128xbf16, #tpu.memory_space<vmem>>, vector<128x128xbf16>
    %cst = arith.constant dense<0.000000e+00> : vector<32x128xf32>
    %2 = tpu.matmul %0, %1, %cst {dimension_numbers = #tpu.dot_dimension_numbers<[1], [0], [0], [1], [0, 0, 1, 1], [], []>} : vector<32x128xbf16>, vector<128x128xbf16>, vector<32x128xf32> -> vector<32x128xf32>
    %c0_3 = arith.constant 0 : index
    %c0_4 = arith.constant 0 : index
    %3 = vector.load %arg3[%c0_3, %c0_4] : memref<1x128xf32, #tpu.memory_space<vmem>>, vector<1x128xf32>
    %4 = vector.broadcast %3 : vector<1x128xf32> to vector<32x128xf32>
    %5 = arith.addf %2, %4 : vector<32x128xf32>
    %cst_5 = arith.constant 0.000000e+00 : f32
    %6 = vector.broadcast %cst_5 : f32 to vector<32x128xf32>
    %7 = arith.maximumf %5, %6 : vector<32x128xf32>
    %8 = arith.truncf %7 : vector<32x128xf32> to vector<32x128xbf16>
    %c0_6 = arith.constant 0 : index
    %c0_7 = arith.constant 0 : index
    %9 = vector.load %arg4[%c0_6, %c0_7] : memref<128x128xbf16, #tpu.memory_space<vmem>>, vector<128x128xbf16>
    %cst_8 = arith.constant dense<0.000000e+00> : vector<32x128xf32>
    %10 = tpu.matmul %8, %9, %cst_8 {dimension_numbers = #tpu.dot_dimension_numbers<[1], [0], [0], [1], [0, 0, 1, 1], [], []>} : vector<32x128xbf16>, vector<128x128xbf16>, vector<32x128xf32> -> vector<32x128xf32>
    %c0_9 = arith.constant 0 : index
    %c0_10 = arith.constant 0 : index
    %11 = vector.load %arg5[%c0_9, %c0_10] : memref<1x128xf32, #tpu.memory_space<vmem>>, vector<1x128xf32>
    %12 = vector.broadcast %11 : vector<1x128xf32> to vector<32x128xf32>
    %13 = arith.addf %10, %12 : vector<32x128xf32>
    %cst_11 = arith.constant 0.000000e+00 : f32
    %14 = vector.broadcast %cst_11 : f32 to vector<32x128xf32>
    %15 = arith.maximumf %13, %14 : vector<32x128xf32>
    %16 = arith.truncf %15 : vector<32x128xf32> to vector<32x128xbf16>
    %c0_12 = arith.constant 0 : index
    %c0_13 = arith.constant 0 : index
    %17 = vector.load %arg6[%c0_12, %c0_13] : memref<128x128xbf16, #tpu.memory_space<vmem>>, vector<128x128xbf16>
    %cst_14 = arith.constant dense<0.000000e+00> : vector<32x128xf32>
    %18 = tpu.matmul %16, %17, %cst_14 {dimension_numbers = #tpu.dot_dimension_numbers<[1], [0], [0], [1], [0, 0, 1, 1], [], []>} : vector<32x128xbf16>, vector<128x128xbf16>, vector<32x128xf32> -> vector<32x128xf32>
    %c0_15 = arith.constant 0 : index
    %c0_16 = arith.constant 0 : index
    %19 = vector.load %arg7[%c0_15, %c0_16] : memref<1x128xf32, #tpu.memory_space<vmem>>, vector<1x128xf32>
    %20 = vector.broadcast %19 : vector<1x128xf32> to vector<32x128xf32>
    %21 = arith.addf %18, %20 : vector<32x128xf32>
    %cst_17 = arith.constant 0.000000e+00 : f32
    %22 = vector.broadcast %cst_17 : f32 to vector<32x128xf32>
    %23 = arith.maximumf %21, %22 : vector<32x128xf32>
    %24 = arith.truncf %23 : vector<32x128xf32> to vector<32x128xbf16>
    %c0_18 = arith.constant 0 : index
    %c0_19 = arith.constant 0 : index
    %25 = vector.load %arg8[%c0_18, %c0_19] : memref<128x128xbf16, #tpu.memory_space<vmem>>, vector<128x128xbf16>
    %cst_20 = arith.constant dense<0.000000e+00> : vector<32x128xf32>
    %26 = tpu.matmul %24, %25, %cst_20 {dimension_numbers = #tpu.dot_dimension_numbers<[1], [0], [0], [1], [0, 0, 1, 1], [], []>} : vector<32x128xbf16>, vector<128x128xbf16>, vector<32x128xf32> -> vector<32x128xf32>
    %c0_21 = arith.constant 0 : index
    %c0_22 = arith.constant 0 : index
    %27 = vector.load %arg9[%c0_21, %c0_22] : memref<1x128xf32, #tpu.memory_space<vmem>>, vector<1x128xf32>
    %28 = vector.broadcast %27 : vector<1x128xf32> to vector<32x128xf32>
    %29 = arith.addf %26, %28 : vector<32x128xf32>
    %30 = vector.shape_cast %29 : vector<32x128xf32> to vector<2x16x128xf32>
    %cst_23 = arith.constant dense<0xFF800000> : vector<2x128xf32>
    %31 = vector.multi_reduction <maximumf>, %30, %cst_23 [1] : vector<2x16x128xf32> to vector<2x128xf32>
    %32 = vector.shape_cast %31 : vector<2x128xf32> to vector<2x1x128xf32>
    %33 = vector.broadcast %32 : vector<2x1x128xf32> to vector<2x16x128xf32>
    %34 = arith.subf %30, %33 : vector<2x16x128xf32>
    %35 = math.exp %34 : vector<2x16x128xf32>
    %cst_24 = arith.constant dense<0.000000e+00> : vector<2x128xf32>
    %36 = vector.multi_reduction <add>, %35, %cst_24 [1] : vector<2x16x128xf32> to vector<2x128xf32>
    %37 = vector.shape_cast %36 : vector<2x128xf32> to vector<2x1x128xf32>
    %38 = math.log %37 : vector<2x1x128xf32>
    %39 = vector.broadcast %38 : vector<2x1x128xf32> to vector<2x16x128xf32>
    %40 = arith.subf %34, %39 : vector<2x16x128xf32>
    %41 = vector.shape_cast %40 : vector<2x16x128xf32> to vector<32x128xf32>
    %c0_25 = arith.constant 0 : index
    %c0_26 = arith.constant 0 : index
    %42 = vector.load %arg10[%c0_25, %c0_26] : memref<32x128xf32, #tpu.memory_space<vmem>>, vector<32x128xf32>
    tpu.vector_store %arg10[%c0_25, %c0_26], %41 {strides = array<i32>} : memref<32x128xf32, #tpu.memory_space<vmem>>, vector<32x128xf32>,
    return
  }
  func.func @transform_0(%arg0: i32) -> (i32, i32) {
    %c0_i32 = arith.constant 0 : i32
    %c0_i32_0 = arith.constant 0 : i32
    return %arg0, %c0_i32 : i32, i32
  }
  func.func @transform_1(%arg0: i32) -> (i32, i32) {
    %c0_i32 = arith.constant 0 : i32
    %c0_i32_0 = arith.constant 0 : i32
    %c0_i32_1 = arith.constant 0 : i32
    return %c0_i32, %c0_i32_0 : i32, i32
  }
  func.func @transform_2(%arg0: i32) -> (i32, i32) {
    %c0_i32 = arith.constant 0 : i32
    %c0_i32_0 = arith.constant 0 : i32
    %c0_i32_1 = arith.constant 0 : i32
    return %c0_i32, %c0_i32_0 : i32, i32
  }
  func.func @transform_3(%arg0: i32) -> (i32, i32) {
    %c0_i32 = arith.constant 0 : i32
    %c0_i32_0 = arith.constant 0 : i32
    %c0_i32_1 = arith.constant 0 : i32
    return %c0_i32, %c0_i32_0 : i32, i32
  }
  func.func @transform_4(%arg0: i32) -> (i32, i32) {
    %c0_i32 = arith.constant 0 : i32
    %c0_i32_0 = arith.constant 0 : i32
    %c0_i32_1 = arith.constant 0 : i32
    return %c0_i32, %c0_i32_0 : i32, i32
  }
  func.func @transform_5(%arg0: i32) -> (i32, i32) {
    %c0_i32 = arith.constant 0 : i32
    %c0_i32_0 = arith.constant 0 : i32
    %c0_i32_1 = arith.constant 0 : i32
    return %c0_i32, %c0_i32_0 : i32, i32
  }
  func.func @transform_6(%arg0: i32) -> (i32, i32) {
    %c0_i32 = arith.constant 0 : i32
    %c0_i32_0 = arith.constant 0 : i32
    %c0_i32_1 = arith.constant 0 : i32
    return %c0_i32, %c0_i32_0 : i32, i32
  }
  func.func @transform_7(%arg0: i32) -> (i32, i32) {
    %c0_i32 = arith.constant 0 : i32
    %c0_i32_0 = arith.constant 0 : i32
    %c0_i32_1 = arith.constant 0 : i32
    return %c0_i32, %c0_i32_0 : i32, i32
  }
  func.func @transform_8(%arg0: i32) -> (i32, i32) {
    %c0_i32 = arith.constant 0 : i32
    %c0_i32_0 = arith.constant 0 : i32
    %c0_i32_1 = arith.constant 0 : i32
    return %c0_i32, %c0_i32_0 : i32, i32
  }
  func.func @transform_9(%arg0: i32) -> (i32, i32) {
    %c0_i32 = arith.constant 0 : i32
    %c0_i32_0 = arith.constant 0 : i32
    return %arg0, %c0_i32 : i32, i32
  }
}

</mosaic_0001>

<bundles_post_ra>
// kernel: forward.1
= control target key start
LH: loop header
LB: loop body
LE: loop exit
PB: predicated region body
PF: predicated region fallthrough
CT: control target
= control target key end

     0   :  { %14 = vsyncpa [#allocation3], 0  ;;  %s904_s0 = inlined_call_operand.vmem [shape: bf16[32,128], index: 0, kind: input, shape index: {}]   ;;  %s905_s1 = inlined_call_operand.hbm [shape: bf16[128,128], index: 1, kind: input, shape index: {}]   ;;  %s906_s2 = inlined_call_operand.vmem [shape: f32[1,128], index: 2, kind: input, shape index: {}]   ;;  %s907_s3 = inlined_call_operand.hbm [shape: bf16[128,128], index: 3, kind: input, shape index: {}]   ;;  %s908_s4 = inlined_call_operand.vmem [shape: f32[1,128], index: 4, kind: input, shape index: {}]   ;;  %s909_s5 = inlined_call_operand.hbm [shape: bf16[128,128], index: 5, kind: input, shape index: {}]   ;;  %s910_s6 = inlined_call_operand.vmem [shape: f32[1,128], index: 6, kind: input, shape index: {}]   ;;  %s911_s7 = inlined_call_operand.vmem [shape: bf16[128,128], index: 7, kind: input, shape index: {}]   ;;  %s912_s8 = inlined_call_operand.vmem [shape: f32[1,128], index: 8, kind: input, shape index: {}]   ;;  %s913_s9 = inlined_call_operand.vmem [shape: f32[32,128], index: 9, kind: output, shape index: {}]  }
   0x1   :  { %15 = vsyncpa [#allocation5], 0  ;;  %s37_s11 = sshll.u32 %s907_s3, 4  ;;  %s786_s12 = smov [#allocation4]   ;;  %s38_s11 = int_to_ptr.hbm [resolvable:$true] %s37_s11 }
   0x2   :  { %s39_s13 = sshll.u32 %s786_s12, 4  ;;  %s22_s16 = sshll.u32 %s905_s1, 4  ;;  %s40_s13 = int_to_ptr.vmem [resolvable:$true] %s39_s13  ;;  %s23_s16 = int_to_ptr.hbm [resolvable:$true] %s22_s16 }
   0x3   :  { %s787_s17 = smov 64   ;;  %s788_s18 = smov 4  }
   0x4   :  { %45 = dma.hbm_to_vmem [thread:$0]  %s38_s11, 1024, %s40_s13, [#allocation5], %s787_s17, %s787_s17, %s788_s18  }
   0x5   :  { %s789_s19 = smov [#allocation2]   ;;  %s52_s23 = sshll.u32 %s909_s5, 4  ;;  %s53_s23 = int_to_ptr.hbm [resolvable:$true] %s52_s23 }
   0x6   :  { %s24_s20 = sshll.u32 %s789_s19, 4  ;;  %s790_s3 = smov [#allocation6]   ;;  %s25_s20 = int_to_ptr.vmem [resolvable:$true] %s24_s20 }
   0x7   :  { %30 = dma.hbm_to_vmem [thread:$0]  %s23_s16, 1024, %s25_s20, [#allocation3], %s787_s17, %s787_s17, %s788_s18  }
   0x8   :  { %s54_s24 = sshll.u32 %s790_s3, 4  ;;  %s55_s24 = int_to_ptr.vmem [resolvable:$true] %s54_s24 }
   0x9   :  { %60 = dma.hbm_to_vmem [thread:$0]  %s53_s23, 1024, %s55_s24, [#allocation5], %s787_s17, %s787_s17, %s788_s18  }
   0xa   :  { %782 = dma.done.wait [#allocation3], 1024  }
   0xb   :  { %783 = vsyncadd [#allocation3], 4294966272 }
   0xc   :  { %784 = dma.done.wait [#allocation5], 2048  }
   0xd   :  { %785 = vsyncadd [#allocation5], 4294965248  ;;  %v664_v0 = vld [vmem:[#allocation2 + $0x38] sm:$0xff]  ;;  %v663_v1 = vld [vmem:[#allocation2 + $0x30] sm:$0xff] }
   0xe   :  { %163 = vmatpush.bf16.msra.mxu0 %v664_v0  ;;  %v662_v2 = vld [vmem:[#allocation2 + $0x28] sm:$0xff]  ;;  %v661_v3 = vld [vmem:[#allocation2 + $0x20] sm:$0xff]  ;;  %v660_v4 = vld [vmem:[#allocation2 + $0x18] sm:$0xff] }
   0xf   :  { %v672_v5 = vld [vmem:[#allocation4 + $0x38] sm:$0xff]  ;;  %v659_v6 = vld [vmem:[#allocation2 + $0x10] sm:$0xff]  ;;  %v658_v8 = vld [vmem:[#allocation2 + $0x8] sm:$0xff] }
  0x10   :  { %256 = vmatpush.bf16.msra.mxu1 %v672_v5  ;;  %v671_v7 = vld [vmem:[#allocation4 + $0x30] sm:$0xff]  ;;  %v670_v9 = vld [vmem:[#allocation4 + $0x28] sm:$0xff]  ;;  %v657_v10 = vld [vmem:[#allocation2] sm:$0xff] }
  0x11   :  { %v669_v11 = vld [vmem:[#allocation4 + $0x20] sm:$0xff]  ;;  %v656_v13 = vld [vmem:[%s904_s0 + $0x8] sm:$0xff]  ;;  %v668_v14 = vld [vmem:[#allocation4 + $0x18] sm:$0xff] }
  0x12   :  { %164 = vmatpush.bf16.msra.mxu0 %v663_v1  ;;  %v655_v12 = vld [vmem:[%s904_s0] sm:$0xff]  ;;  %v667_v15 = vld [vmem:[#allocation4 + $0x10] sm:$0xff]  ;;  %v666_v16 = vld [vmem:[#allocation4 + $0x8] sm:$0xff] }
  0x13   :  { %v665_v17 = vld [vmem:[#allocation4] sm:$0xff]  ;;  %v680_v18 = vld [vmem:[#allocation6 + $0x38] sm:$0xff]  ;;  %v679_v20 = vld [vmem:[#allocation6 + $0x30] sm:$0xff] }
  0x14   :  { %257 = vmatpush.bf16.msra.mxu1 %v671_v7  ;;  %349 = vmatpush.bf16.msra.mxu2 %v680_v18  ;;  %v694_v21 = vld [vmem:[%s906_s2] ss:$0 sm:$0xff]  ;;  %v678_v22 = vld [vmem:[#allocation6 + $0x28] sm:$0xff]  ;;  %v676_v37 = vld [vmem:[#allocation6 + $0x18] sm:$0xff] }
  0x15   :  { %v677_v26 = vld [vmem:[#allocation6 + $0x20] sm:$0xff]  ;;  %v675_v38 = vld [vmem:[#allocation6 + $0x10] sm:$0xff]  ;;  %v674_v39 = vld [vmem:[#allocation6 + $0x8] sm:$0xff] }
  0x16   :  { %165 = vmatpush.bf16.msra.mxu0 %v662_v2  ;;  %v673_v40 = vld [vmem:[#allocation6] sm:$0xff]  ;;  %v688_v41 = vld [vmem:[%s911_s7 + $0x38] sm:$0xff]  ;;  %v687_v43 = vld [vmem:[%s911_s7 + $0x30] sm:$0xff] }
  0x17   :  { %442 = vmatpush.bf16.msra.mxu3 %v688_v41  ;;  %v695_v44 = vld [vmem:[%s908_s4] ss:$0 sm:$0xff]  ;;  %v686_v45 = vld [vmem:[%s911_s7 + $0x28] sm:$0xff]  ;;  %v684_v60 = vld [vmem:[%s911_s7 + $0x18] sm:$0xff] }
  0x18   :  { %258 = vmatpush.bf16.msra.mxu1 %v670_v9  ;;  %350 = vmatpush.bf16.msra.mxu2 %v679_v20  ;;  %v685_v49 = vld [vmem:[%s911_s7 + $0x20] sm:$0xff]  ;;  %v683_v61 = vld [vmem:[%s911_s7 + $0x10] sm:$0xff]  ;;  %v682_v62 = vld [vmem:[%s911_s7 + $0x8] sm:$0xff] }
  0x19   :  { %v681_v63 = vld [vmem:[%s911_s7] sm:$0xff] }
  0x1a   :  { %166 = vmatpush.bf16.msra.mxu0 %v661_v3  ;;  %v696_v1 = vld [vmem:[%s910_s6] ss:$0 sm:$0xff] }
  0x1b   :  { %443 = vmatpush.bf16.msra.mxu3 %v687_v43 }
  0x1c   :  { %259 = vmatpush.bf16.msra.mxu1 %v669_v11  ;;  %351 = vmatpush.bf16.msra.mxu2 %v678_v22 }
  0x1e   :  { %167 = vmatpush.bf16.msra.mxu0 %v660_v4 }
  0x1f   :  { %444 = vmatpush.bf16.msra.mxu3 %v686_v45 }
  0x20   :  { %260 = vmatpush.bf16.msra.mxu1 %v668_v14  ;;  %352 = vmatpush.bf16.msra.mxu2 %v677_v26 }
  0x22   :  { %168 = vmatpush.bf16.msra.mxu0 %v659_v6 }
  0x23   :  { %445 = vmatpush.bf16.msra.mxu3 %v685_v49 }
  0x24   :  { %261 = vmatpush.bf16.msra.mxu1 %v667_v15  ;;  %353 = vmatpush.bf16.msra.mxu2 %v676_v37 }
  0x26   :  { %169 = vmatpush.bf16.msra.mxu0 %v658_v8 }
  0x27   :  { %446 = vmatpush.bf16.msra.mxu3 %v684_v60 }
  0x28   :  { %262 = vmatpush.bf16.msra.mxu1 %v666_v16  ;;  %354 = vmatpush.bf16.msra.mxu2 %v675_v38  ;;  %v697_v16 = vld [vmem:[%s912_s8] ss:$0 sm:$0xff] }
  0x2a   :  { %170 = vmatpush.bf16.msra.mxu0 %v657_v10 }
  0x2b   :  { %447 = vmatpush.bf16.msra.mxu3 %v683_v61 }
  0x2c   :  { %263 = vmatpush.bf16.msra.mxu1 %v665_v17  ;;  %355 = vmatpush.bf16.msra.mxu2 %v674_v39 }
  0x2d   :  { %171 = vmatmul.bf16.vlgmr.msra.gmra.mxu0 %v655_v12 }
  0x2f   :  { %448 = vmatpush.bf16.msra.mxu3 %v682_v62 }
  0x30   :  { %356 = vmatpush.bf16.msra.mxu2 %v673_v40 }
  0x33   :  { %449 = vmatpush.bf16.msra.mxu3 %v681_v63 }
  0x3d   :  { %176 = vmatmul.bf16.gmra.mxu0 %v656_v13 }
  0xaa   :  { %v172_v19 = vpop.f32.mrf.mxu0 }
  0xab   :  { %v173_v23 = vadd.f32 %v694_v21, %v172_v19 }
  0xad   :  { %v182_v27 = vmax.f32 %v173_v23, 0.0 }
  0xb2   :  { %v174_v24 = vpop.f32.mrf.mxu0 }
  0xb3   :  { %v175_v25 = vadd.f32 %v694_v21, %v174_v24 }
  0xb5   :  { %v183_v28 = vmax.f32 %v175_v25, 0.0 }
  0xb7   :  { %v186_v29 = vpack.c.bf16 %v183_v28, %v182_v27 }
  0xb9   :  { %264 = vmatmul.bf16.vlgmr.msra.gmra.mxu1 %v186_v29 }
  0xba   :  { %v177_v30 = vpop.f32.mrf.mxu0 }
  0xbb   :  { %v178_v31 = vadd.f32 %v694_v21, %v177_v30 }
  0xbd   :  { %v184_v34 = vmax.f32 %v178_v31, 0.0 }
  0xc2   :  { %v179_v32 = vpop.f32.mrf.mxu0 }
  0xc3   :  { %v180_v33 = vadd.f32 %v694_v21, %v179_v32 }
  0xc5   :  { %v185_v35 = vmax.f32 %v180_v33, 0.0 }
  0xc7   :  { %v187_v36 = vpack.c.bf16 %v185_v35, %v184_v34 }
  0xc9   :  { %269 = vmatmul.bf16.gmra.mxu1 %v187_v36 }
 0x136   :  { %v265_v42 = vpop.f32.mrf.mxu1 }
 0x137   :  { %v266_v46 = vadd.f32 %v695_v44, %v265_v42 }
 0x139   :  { %v275_v50 = vmax.f32 %v266_v46, 0.0 }
 0x13e   :  { %v267_v47 = vpop.f32.mrf.mxu1 }
 0x13f   :  { %v268_v48 = vadd.f32 %v695_v44, %v267_v47 }
 0x141   :  { %v276_v51 = vmax.f32 %v268_v48, 0.0 }
 0x143   :  { %v279_v52 = vpack.c.bf16 %v276_v51, %v275_v50 }
 0x145   :  { %357 = vmatmul.bf16.vlgmr.msra.gmra.mxu2 %v279_v52 }
 0x146   :  { %v270_v53 = vpop.f32.mrf.mxu1 }
 0x147   :  { %v271_v54 = vadd.f32 %v695_v44, %v270_v53 }
 0x149   :  { %v277_v57 = vmax.f32 %v271_v54, 0.0 }
 0x14e   :  { %v272_v55 = vpop.f32.mrf.mxu1 }
 0x14f   :  { %v273_v56 = vadd.f32 %v695_v44, %v272_v55 }
 0x151   :  { %v278_v58 = vmax.f32 %v273_v56, 0.0 }
 0x153   :  { %v280_v59 = vpack.c.bf16 %v278_v58, %v277_v57 }
 0x155   :  { %362 = vmatmul.bf16.gmra.mxu2 %v280_v59 }
 0x1c8   :  { %v358_v0 = vpop.f32.mrf.mxu2 }
 0x1c9   :  { %v359_v2 = vadd.f32 %v696_v1, %v358_v0 }
 0x1cb   :  { %v368_v5 = vmax.f32 %v359_v2, 0.0 }
 0x1d0   :  { %v360_v3 = vpop.f32.mrf.mxu2 }
 0x1d1   :  { %v361_v4 = vadd.f32 %v696_v1, %v360_v3 }
 0x1d3   :  { %v369_v6 = vmax.f32 %v361_v4, 0.0 }
 0x1d5   :  { %v372_v7 = vpack.c.bf16 %v369_v6, %v368_v5 }
 0x1d7   :  { %450 = vmatmul.bf16.vlgmr.msra.gmra.mxu3 %v372_v7 }
 0x1d8   :  { %v363_v8 = vpop.f32.mrf.mxu2 }
 0x1d9   :  { %v364_v9 = vadd.f32 %v696_v1, %v363_v8 }
 0x1db   :  { %v370_v12 = vmax.f32 %v364_v9, 0.0 }
 0x1e0   :  { %v365_v10 = vpop.f32.mrf.mxu2 }
 0x1e1   :  { %v366_v11 = vadd.f32 %v696_v1, %v365_v10 }
 0x1e3   :  { %v371_v13 = vmax.f32 %v366_v11, 0.0 }
 0x1e5   :  { %v373_v14 = vpack.c.bf16 %v371_v13, %v370_v12 }
 0x1e7   :  { %455 = vmatmul.bf16.gmra.mxu3 %v373_v14 }
 0x25a   :  { %v451_v15 = vpop.f32.mrf.mxu3 }
 0x25b   :  { %v452_v18 = vadd.f32 %v697_v16, %v451_v15 }
 0x262   :  { %v453_v17 = vpop.f32.mrf.mxu3 }
 0x263   :  { %v454_v19 = vadd.f32 %v697_v16, %v453_v17 }
 0x265   :  { %v461_v20 = vmax.f32 %v452_v18, %v454_v19 }
 0x267   :  { %v462_v21 = vrot.slane %v461_v20, 4 }
 0x269   :  { %v463_v22 = vmax.f32 %v461_v20, %v462_v21 }
 0x26a   :  { %v456_v23 = vpop.f32.mrf.mxu3 }
 0x26b   :  { %v464_v24 = vrot.slane %v463_v22, 2  ;;  %v457_v31 = vadd.f32 %v697_v16, %v456_v23 }
 0x26d   :  { %v465_v25 = vmax.f32 %v463_v22, %v464_v24 }
 0x26f   :  { %v466_v26 = vrot.slane %v465_v25, 1 }
 0x271   :  { %v467_v27 = vmax.f32 %v465_v25, %v466_v26 }
 0x272   :  { %v458_v28 = vpop.f32.mrf.mxu3 }
 0x273   :  { %v475_v29 = vsub.f32 %v452_v18, %v467_v27  ;;  %v476_v30 = vsub.f32 %v454_v19, %v467_v27  ;;  %v459_v32 = vadd.f32 %v697_v16, %v458_v28 }
 0x275   :  { %v479_v33 = vmul.f32 1.442695, %v475_v29  ;;  %v481_v34 = vmul.f32 1.442695, %v476_v30  ;;  %v468_v35 = vmax.f32 %v457_v31, %v459_v32 }
 0x277   :  { %698 = vpow2.f32 %v479_v33  ;;  %v469_v36 = vrot.slane %v468_v35, 4 }
 0x278   :  { %700 = vpow2.f32 %v481_v34 }
 0x279   :  { %v470_v37 = vmax.f32 %v468_v35, %v469_v36 }
 0x27b   :  { %v471_v38 = vrot.slane %v470_v37, 2 }
 0x27d   :  { %v699_v39 = vpop.eup %698  ;;  %v472_v40 = vmax.f32 %v470_v37, %v471_v38 }
 0x27e   :  { %v701_v41 = vpop.eup %700 }
 0x27f   :  { %v487_v42 = vadd.f32 %v701_v41, %v699_v39  ;;  %v473_v43 = vrot.slane %v472_v40, 1 }
 0x281   :  { %v488_v44 = vrot.slane %v487_v42, 4  ;;  %v474_v45 = vmax.f32 %v472_v40, %v473_v43 }
 0x283   :  { %v489_v46 = vadd.f32 %v488_v44, %v487_v42  ;;  %v477_v47 = vsub.f32 %v457_v31, %v474_v45  ;;  %v478_v48 = vsub.f32 %v459_v32, %v474_v45 }
 0x285   :  { %v490_v49 = vrot.slane %v489_v46, 2  ;;  %v483_v50 = vmul.f32 1.442695, %v477_v47  ;;  %v485_v51 = vmul.f32 1.442695, %v478_v48 }
 0x287   :  { %v491_v52 = vadd.f32 %v490_v49, %v489_v46  ;;  %702 = vpow2.f32 %v483_v50 }
 0x288   :  { %704 = vpow2.f32 %v485_v51 }
 0x289   :  { %v492_v53 = vrot.slane %v491_v52, 1 }
 0x28b   :  { %v493_v54 = vadd.f32 %v492_v53, %v491_v52 }
 0x28d   :  { %v703_v55 = vpop.eup %702  ;;  %706 = vlog2.f32 %v493_v54 }
 0x28e   :  { %v705_v56 = vpop.eup %704 }
 0x28f   :  { %v494_v57 = vadd.f32 %v705_v56, %v703_v55 }
 0x291   :  { %v495_v58 = vrot.slane %v494_v57, 4 }
 0x293   :  { %v707_v59 = vpop.eup %706  ;;  %v496_v60 = vadd.f32 %v495_v58, %v494_v57 }
 0x294   :  { %v502_v61 = vmul.f32 0.6931472, %v707_v59 }
 0x295   :  { %v497_v62 = vrot.slane %v496_v60, 2 }
 0x296   :  { %v505_v63 = vsub.f32 %v475_v29, %v502_v61  ;;  %v506_v0 = vsub.f32 %v476_v30, %v502_v61 }
 0x297   :  { %v498_v1 = vadd.f32 %v497_v62, %v496_v60 }
 0x298   :  { %509 = vst [vmem:[%s913_s9] sm:$0xff] %v505_v63 }
 0x299   :  { %510 = vst [vmem:[%s913_s9 + $0x8] sm:$0xff] %v506_v0  ;;  %v499_v2 = vrot.slane %v498_v1, 1 }
 0x29b   :  { %v500_v3 = vadd.f32 %v499_v2, %v498_v1 }
 0x29d   :  { %708 = vlog2.f32 %v500_v3 }
 0x2a3   :  { %v709_v4 = vpop.eup %708 }
 0x2a4   :  { %v504_v5 = vmul.f32 0.6931472, %v709_v4 }
 0x2a6   :  { %v507_v6 = vsub.f32 %v477_v47, %v504_v5  ;;  %v508_v7 = vsub.f32 %v478_v48, %v504_v5 }
 0x2a8   :  { %511 = vst [vmem:[%s913_s9 + $0x10] sm:$0xff] %v507_v6 }
 0x2a9   :  { %512 = vst [vmem:[%s913_s9 + $0x18] sm:$0xff] %v508_v7 }
 0x2aa   :  { %517 = vsyncpa [#allocation3], 1 }
 0x2ab   :  { %518 = vsyncpa [#allocation5], 1 }

</bundles_post_ra>
